<compile_context>
chip_gen: v7x
topology: tpu7x:2x2x1
jax: 0.10.0
libtpu: 0.0.40
codegen_flags: <defaults>
</compile_context>

<pallas_src>
import numpy as np
import jax
import jax.numpy as jnp
from jax.experimental import pallas as pl
from jax.experimental.pallas import tpu as pltpu


# --------------------------------------------------------------------------- #
# Kernel                                                                      #
# --------------------------------------------------------------------------- #
def make_cnn_kernel(d):
    N, C1, C2 = d["N"], d["C1"], d["C2"]
    L3, L4 = d["L3"], d["L4"]
    K1C, H1P, HALF = d["K1C"], d["H1P"], d["HALF"]
    L2N = d["L2"] * N
    R1 = K1C              # conv2 tap-0 weight rows start
    R2 = K1C + C1         # conv2 tap-1 weight rows start

    def kernel(xp_ref, wconv_ref, wfc1_hbm, b_ref, out_ref, fcbuf, fcsem):
        # -- start the fc1 weight DMA now; it completes under conv compute ---
        fc_cp = pltpu.make_async_copy(wfc1_hbm, fcbuf, fcsem)
        fc_cp.start()

        # -- biases / fc2 weight row (f32, one load each) ---------------------
        b1 = b_ref[0:1, 0:C1]
        b2 = b_ref[1:2, 0:C2]
        fb1 = b_ref[2:3, :]
        fw2row = b_ref[3:4, :]
        fb2 = b_ref[4:5, 0:1]

        # -- conv1: single im2col matmul (bf16 operands, f32 accumulation) ----
        h1 = jnp.dot(xp_ref[...], wconv_ref[0:K1C, 0:C1],
                     preferred_element_type=jnp.float32) + b1      # (2*HALF, C1)

        # -- maxpool1 (k=2,s=2) + relu: even-time half vs odd-time half -------
        p1 = jnp.maximum(jnp.maximum(h1[:HALF, :], h1[HALF:, :]), 0.0)
        # zero the bias-contaminated pad rows (rows >= L2*N) so they can never
        # leak into conv2, whatever the slicing below becomes.
        rid = jax.lax.broadcasted_iota(jnp.int32, p1.shape, 0)
        p1 = jnp.where(rid < L2N, p1, 0.0).astype(jnp.bfloat16)    # (HALF, C1)

        # -- conv2: two K=C1 matmuls summed (no lane concat) -------------------
        h2 = (jnp.dot(p1[0:L3 * N, :], wconv_ref[R1:R1 + C1, 0:C2],
                      preferred_element_type=jnp.float32)
              + jnp.dot(p1[N:(L3 + 1) * N, :], wconv_ref[R2:R2 + C1, 0:C2],
                        preferred_element_type=jnp.float32)
              + b2)                                                 # (L3*N, C2)

        # -- maxpool2 (k=2,s=2) + relu -----------------------------------------
        pooled = [jnp.maximum(h2[2 * s * N:(2 * s + 1) * N, :],
                              h2[(2 * s + 1) * N:(2 * s + 2) * N, :])
                  for s in range(L4)]
        p2 = pooled[0] if L4 == 1 else jnp.concatenate(pooled, axis=0)
        p2 = jnp.maximum(p2, 0.0).astype(jnp.bfloat16)              # (L4*N, C2)

        # -- fc1: sum of per-row (1,C2)x(C2,H1P) matmuls (no lane concat) ------
        fc_cp.wait()                    # fc1 weight now resident in VMEM
        y1 = fb1
        for r in range(L4 * N):
            y1 = y1 + jnp.dot(p2[r:r + 1, :], fcbuf[r * C2:(r + 1) * C2, :],
                              preferred_element_type=jnp.float32)   # (1, H1P)

        # -- fc2 on the VPU (mul + lane reduce) + sigmoid ----------------------
        logit = jnp.sum(y1 * fw2row, axis=-1, keepdims=True) + fb2  # (1, 1)
        out_ref[...] = jnp.broadcast_to(1.0 / (1.0 + jnp.exp(-logit)),
                                        out_ref.shape)              # lane-dense

    return kernel


# --------------------------------------------------------------------------- #
# One-time parameter packing (hoisted out of the per-call path)               #
# --------------------------------------------------------------------------- #
def pack_params(params, in_size):
    w1, b1, w2, b2, fw1, fb1, fw2, fb2 = params
    N, C, L = in_size
    C1, K1, S1 = w1.shape[0], w1.shape[2], 2
    C2, K2 = w2.shape[0], w2.shape[2]
    H1 = fw1.shape[0]
    L1 = (L - K1) // S1 + 1
    L2 = L1 // 2
    L3 = L2 - K2 + 1
    L4 = L3 // 2
    LIN = N * C2 * L4                        # torch's linear_in_size (incl. batch)
    if fw1.shape[1] != LIN:
        raise ValueError("forward batch must equal in_size[0] (torch flatten quirk)")

    K1C = K1 * C
    H1P = ((H1 + 127) // 128) * 128          # lane-pad fc hidden dim
    HALF = ((L2 * N + 7) // 8) * 8           # sublane-aligned half for pool1 slab max
    CW = max(C1, C2)

    def pad_cols(a, cols):
        return jnp.pad(a, ((0, 0), (0, cols - a.shape[1])))

    # conv weights: rows (k, c_in) for conv1, then (k, c1) for conv2 (tap-split)
    w1m = jnp.transpose(w1, (2, 1, 0)).reshape(K1C, C1)
    w2m = jnp.transpose(w2, (2, 1, 0)).reshape(K2 * C1, C2)
    wconv = jnp.concatenate([pad_cols(w1m, CW), pad_cols(w2m, CW)],
                            axis=0).astype(jnp.bfloat16)            # (K1C+K2*C1, CW)

    # fc1 weight, rows re-ordered to (l, n, c) to match the kernel's p2 layout
    fw1p = (fw1.T.reshape(N, C2, L4, H1)
                 .transpose(2, 0, 1, 3)
                 .reshape(LIN, H1))
    wfc1 = jnp.pad(fw1p, ((0, 0), (0, H1P - H1))).astype(jnp.bfloat16)  # (LIN, H1P)

    # bias slab (f32): b1, b2, fb1, fw2 row, fb2
    def pad_row(v):
        v = jnp.asarray(v, jnp.float32).reshape(1, -1)
        return jnp.pad(v, ((0, 0), (0, H1P - v.shape[1])))

    bslab = jnp.concatenate([pad_row(b1), pad_row(b2), pad_row(fb1),
                             pad_row(fw2.reshape(-1)), pad_row(fb2)], axis=0)

    dims = dict(N=N, C=C, L=L, C1=C1, C2=C2, K1=K1, S1=S1, K2=K2,
                L1=L1, L2=L2, L3=L3, L4=L4, LIN=LIN, K1C=K1C,
                H1=H1, H1P=H1P, HALF=HALF)
    return (wconv, wfc1, bslab), dims


# --------------------------------------------------------------------------- #
# Forward (jittable; only per-input im2col + one pallas_call)                 #
# --------------------------------------------------------------------------- #
def make_cnn_forward(d):
    N, K1, S1, K1C = d["N"], d["K1"], d["S1"], d["K1C"]
    L2, HALF, LIN, H1P = d["L2"], d["HALF"], d["LIN"], d["H1P"]

    kernel = make_cnn_kernel(d)
    vmem = pl.BlockSpec(memory_space=pltpu.MemorySpace.VMEM)
    hbm = pl.BlockSpec(memory_space=pl.ANY)

    call = pl.pallas_call(
        kernel,
        out_shape=jax.ShapeDtypeStruct((1, H1P), jnp.float32),
        in_specs=[vmem, vmem, hbm, vmem],
        out_specs=vmem,
        scratch_shapes=[pltpu.VMEM((LIN, H1P), jnp.bfloat16),
                        pltpu.SemaphoreType.DMA],
    )

    def forward(x, wconv, wfc1, bslab):
        # im2col patches for conv1: rows ordered (even conv times | odd times),
        # each group (pool-step s, batch n); drops the dangling odd step of L1.
        x_nlc = jnp.transpose(x, (0, 2, 1))                        # (N, L, C)

        def tap(t):
            return x_nlc[:, S1 * t:S1 * t + K1, :].reshape(N, K1C)

        even = jnp.concatenate([tap(2 * s) for s in range(L2)], axis=0)
        odd = jnp.concatenate([tap(2 * s + 1) for s in range(L2)], axis=0)
        pad_r = ((0, HALF - L2 * N), (0, 0))
        xp = jnp.concatenate([jnp.pad(even, pad_r), jnp.pad(odd, pad_r)],
                             axis=0).astype(jnp.bfloat16)          # (2*HALF, K1C)

        out = call(xp, wconv, wfc1, bslab)                          # (1, H1P)
        return out[:, 0:1]                                          # (1, 1)

    return forward


# --------------------------------------------------------------------------- #
# Pure-numpy reference (mirror of the PyTorch forward)                        #
# --------------------------------------------------------------------------- #
def reference_forward(x, params):
    w1, b1, w2, b2, fw1, fb1, fw2, fb2 = params
    N, C, L = x.shape
    L1 = (L - 4) // 2 + 1
    h1 = np.zeros((N, 64, L1), np.float32)
    for t in range(L1):
        h1[:, :, t] = np.einsum('nck,ock->no', x[:, :, 2 * t:2 * t + 4], w1) + b1
    L2 = L1 // 2
    p1 = np.maximum(h1[:, :, :2 * L2].reshape(N, 64, L2, 2).max(-1), 0.0)
    L3 = L2 - 2 + 1
    h2 = np.zeros((N, 64, L3), np.float32)
    for t in range(L3):
        h2[:, :, t] = np.einsum('nck,ock->no', p1[:, :, t:t + 2], w2) + b2
    L4 = L3 // 2
    p2 = np.maximum(h2[:, :, :2 * L4].reshape(N, 64, L4, 2).max(-1), 0.0)
    flat = p2.reshape(-1, N * 64 * L4)
    y1 = flat @ fw1.T + fb1
    y2 = y1 @ fw2.T + fb2
    return 1.0 / (1.0 + np.exp(-y2))


if __name__ == "__main__":
    # in_size = (2, 4, 16): batch=2, channels=4, length=16
    N, C, L = 2, 4, 16
    C1, C2, H1 = 64, 64, 100
    L1 = (L - 4) // 2 + 1
    L2 = L1 // 2
    L3 = L2 - 2 + 1
    L4 = L3 // 2
    lin = N * C2 * L4          # torch linear_in_size (includes the batch dim)

    key = jax.random.PRNGKey(0)
    ks = jax.random.split(key, 9)
    w1 = 0.1 * jax.random.normal(ks[0], (C1, C, 4), jnp.float32)
    b1 = 0.1 * jax.random.normal(ks[1], (C1,), jnp.float32)
    w2 = 0.1 * jax.random.normal(ks[2], (C2, C1, 2), jnp.float32)
    b2 = 0.1 * jax.random.normal(ks[3], (C2,), jnp.float32)
    fw1 = 0.1 * jax.random.normal(ks[4], (H1, lin), jnp.float32)
    fb1 = 0.1 * jax.random.normal(ks[5], (H1,), jnp.float32)
    fw2 = 0.1 * jax.random.normal(ks[6], (1, H1), jnp.float32)
    fb2 = 0.1 * jax.random.normal(ks[7], (1,), jnp.float32)
    x = jax.random.normal(ks[8], (N, C, L), jnp.float32)

    params = (w1, b1, w2, b2, fw1, fb1, fw2, fb2)

    # --- pack once at init (hoisted out of the jitted per-call path) --------
    packed, dims = pack_params(params, (N, C, L))
    fwd = jax.jit(make_cnn_forward(dims))

    out = jax.block_until_ready(fwd(x, *packed))

    ref = reference_forward(np.asarray(x), [np.asarray(p) for p in params])
    assert out.shape == (1, 1), out.shape
    # Tolerance 1e-2: matmul operands are bf16 (f32 accumulation) per the
    # performance review; pure-f32 semantics are recovered by skipping the cast.
    np.testing.assert_allclose(np.asarray(out), ref, rtol=1e-2, atol=1e-2)
    print("KERNEL_OK")
</pallas_src>

<mosaic_0001>
module attributes {stable_mosaic.version = 11 : i64} {
  func.func @kernel(%arg0: memref<16x16xbf16, #tpu.memory_space<vmem>>, %arg1: memref<144x64xbf16, #tpu.memory_space<vmem>>, %arg2: memref<128x128xbf16, #tpu.memory_space<any>>, %arg3: memref<5x128xf32, #tpu.memory_space<vmem>>, %arg4: memref<1x128xf32, #tpu.memory_space<vmem>>, %arg5: memref<128x128xbf16, #tpu.memory_space<vmem>>, %arg6: memref<!tpu.dma_semaphore, #tpu.memory_space<semaphore_mem>>) attributes {dimension_semantics = [], scalar_prefetch = 0 : i64, scratch_operands = 2 : i64, tpu.core_type = #tpu.core_type<tc>} {
    tpu.enqueue_dma source(%arg2 : memref<128x128xbf16, #tpu.memory_space<any>>) target(%arg5 : memref<128x128xbf16, #tpu.memory_space<vmem>>) target_semaphore(%arg6 : memref<!tpu.dma_semaphore, #tpu.memory_space<semaphore_mem>>)
    %c0 = arith.constant 0 : index
    %c0_0 = arith.constant 0 : index
    %0 = vector.load %arg3[%c0, %c0_0] : memref<5x128xf32, #tpu.memory_space<vmem>>, vector<1x64xf32>
    %c1 = arith.constant 1 : index
    %c0_1 = arith.constant 0 : index
    %1 = vector.load %arg3[%c1, %c0_1] : memref<5x128xf32, #tpu.memory_space<vmem>>, vector<1x64xf32>
    %c2 = arith.constant 2 : index
    %c0_2 = arith.constant 0 : index
    %2 = vector.load %arg3[%c2, %c0_2] : memref<5x128xf32, #tpu.memory_space<vmem>>, vector<1x128xf32>
    %c3 = arith.constant 3 : index
    %c0_3 = arith.constant 0 : index
    %3 = vector.load %arg3[%c3, %c0_3] : memref<5x128xf32, #tpu.memory_space<vmem>>, vector<1x128xf32>
    %c4 = arith.constant 4 : index
    %c0_4 = arith.constant 0 : index
    %4 = vector.load %arg3[%c4, %c0_4] : memref<5x128xf32, #tpu.memory_space<vmem>>, vector<1x1xf32>
    %c0_5 = arith.constant 0 : index
    %c0_6 = arith.constant 0 : index
    %5 = vector.load %arg0[%c0_5, %c0_6] : memref<16x16xbf16, #tpu.memory_space<vmem>>, vector<16x16xbf16>
    %c0_7 = arith.constant 0 : index
    %c0_8 = arith.constant 0 : index
    %6 = vector.load %arg1[%c0_7, %c0_8] : memref<144x64xbf16, #tpu.memory_space<vmem>>, vector<16x64xbf16>
    %cst = arith.constant dense<0.000000e+00> : vector<16x64xf32>
    %7 = tpu.matmul %5, %6, %cst {dimension_numbers = #tpu.dot_dimension_numbers<[1], [0], [0], [1], [0, 0, 1, 1], [], []>} : vector<16x16xbf16>, vector<16x64xbf16>, vector<16x64xf32> -> vector<16x64xf32>
    %8 = vector.broadcast %0 : vector<1x64xf32> to vector<16x64xf32>
    %9 = arith.addf %7, %8 : vector<16x64xf32>
    %10 = vector.extract_strided_slice %9 {offsets = [0, 0], sizes = [8, 64], strides = [1, 1]} : vector<16x64xf32> to vector<8x64xf32>
    %11 = vector.extract_strided_slice %9 {offsets = [8, 0], sizes = [8, 64], strides = [1, 1]} : vector<16x64xf32> to vector<8x64xf32>
    %12 = arith.maximumf %10, %11 : vector<8x64xf32>
    %cst_9 = arith.constant 0.000000e+00 : f32
    %13 = vector.broadcast %cst_9 : f32 to vector<8x64xf32>
    %14 = arith.maximumf %12, %13 : vector<8x64xf32>
    %15 = tpu.iota {dimensions = array<i32: 0>} : vector<8x64xi32>
    %c6_i32 = arith.constant 6 : i32
    %16 = vector.broadcast %c6_i32 : i32 to vector<8x64xi32>
    %17 = arith.cmpi slt, %15, %16 : vector<8x64xi32>
    %cst_10 = arith.constant 0.000000e+00 : f32
    %18 = vector.broadcast %cst_10 : f32 to vector<8x64xf32>
    %19 = arith.select %17, %14, %18 : vector<8x64xi1>, vector<8x64xf32>
    %20 = arith.truncf %19 : vector<8x64xf32> to vector<8x64xbf16>
    %21 = vector.extract_strided_slice %20 {offsets = [0, 0], sizes = [4, 64], strides = [1, 1]} : vector<8x64xbf16> to vector<4x64xbf16>
    %c16 = arith.constant 16 : index
    %c0_11 = arith.constant 0 : index
    %22 = vector.load %arg1[%c16, %c0_11] : memref<144x64xbf16, #tpu.memory_space<vmem>>, vector<64x64xbf16>
    %cst_12 = arith.constant dense<0.000000e+00> : vector<4x64xf32>
    %23 = tpu.matmul %21, %22, %cst_12 {dimension_numbers = #tpu.dot_dimension_numbers<[1], [0], [0], [1], [0, 0, 1, 1], [], []>} : vector<4x64xbf16>, vector<64x64xbf16>, vector<4x64xf32> -> vector<4x64xf32>
    %24 = vector.extract_strided_slice %20 {offsets = [2, 0], sizes = [4, 64], strides = [1, 1]} : vector<8x64xbf16> to vector<4x64xbf16>
    %c80 = arith.constant 80 : index
    %c0_13 = arith.constant 0 : index
    %25 = vector.load %arg1[%c80, %c0_13] : memref<144x64xbf16, #tpu.memory_space<vmem>>, vector<64x64xbf16>
    %cst_14 = arith.constant dense<0.000000e+00> : vector<4x64xf32>
    %26 = tpu.matmul %24, %25, %cst_14 {dimension_numbers = #tpu.dot_dimension_numbers<[1], [0], [0], [1], [0, 0, 1, 1], [], []>} : vector<4x64xbf16>, vector<64x64xbf16>, vector<4x64xf32> -> vector<4x64xf32>
    %27 = arith.addf %23, %26 : vector<4x64xf32>
    %28 = vector.broadcast %1 : vector<1x64xf32> to vector<4x64xf32>
    %29 = arith.addf %27, %28 : vector<4x64xf32>
    %30 = vector.extract_strided_slice %29 {offsets = [0, 0], sizes = [2, 64], strides = [1, 1]} : vector<4x64xf32> to vector<2x64xf32>
    %31 = vector.extract_strided_slice %29 {offsets = [2, 0], sizes = [2, 64], strides = [1, 1]} : vector<4x64xf32> to vector<2x64xf32>
    %32 = arith.maximumf %30, %31 : vector<2x64xf32>
    %cst_15 = arith.constant 0.000000e+00 : f32
    %33 = vector.broadcast %cst_15 : f32 to vector<2x64xf32>
    %34 = arith.maximumf %32, %33 : vector<2x64xf32>
    %35 = arith.truncf %34 : vector<2x64xf32> to vector<2x64xbf16>
    tpu.wait_dma2 semaphore(%arg6 : memref<!tpu.dma_semaphore, #tpu.memory_space<semaphore_mem>>) src(%arg2 : memref<128x128xbf16, #tpu.memory_space<any>>) dst(%arg5 : memref<128x128xbf16, #tpu.memory_space<vmem>>)
    %36 = vector.extract_strided_slice %35 {offsets = [0, 0], sizes = [1, 64], strides = [1, 1]} : vector<2x64xbf16> to vector<1x64xbf16>
    %c0_16 = arith.constant 0 : index
    %c0_17 = arith.constant 0 : index
    %37 = vector.load %arg5[%c0_16, %c0_17] : memref<128x128xbf16, #tpu.memory_space<vmem>>, vector<64x128xbf16>
    %cst_18 = arith.constant dense<0.000000e+00> : vector<1x128xf32>
    %38 = tpu.matmul %36, %37, %cst_18 {dimension_numbers = #tpu.dot_dimension_numbers<[1], [0], [0], [1], [0, 0, 1, 1], [], []>} : vector<1x64xbf16>, vector<64x128xbf16>, vector<1x128xf32> -> vector<1x128xf32>
    %39 = arith.addf %2, %38 : vector<1x128xf32>
    %40 = vector.extract_strided_slice %35 {offsets = [1, 0], sizes = [1, 64], strides = [1, 1]} : vector<2x64xbf16> to vector<1x64xbf16>
    %c64 = arith.constant 64 : index
    %c0_19 = arith.constant 0 : index
    %41 = vector.load %arg5[%c64, %c0_19] : memref<128x128xbf16, #tpu.memory_space<vmem>>, vector<64x128xbf16>
    %cst_20 = arith.constant dense<0.000000e+00> : vector<1x128xf32>
    %42 = tpu.matmul %40, %41, %cst_20 {dimension_numbers = #tpu.dot_dimension_numbers<[1], [0], [0], [1], [0, 0, 1, 1], [], []>} : vector<1x64xbf16>, vector<64x128xbf16>, vector<1x128xf32> -> vector<1x128xf32>
    %43 = arith.addf %39, %42 : vector<1x128xf32>
    %44 = arith.mulf %43, %3 : vector<1x128xf32>
    %cst_21 = arith.constant dense<0.000000e+00> : vector<1xf32>
    %45 = vector.multi_reduction <add>, %44, %cst_21 [1] : vector<1x128xf32> to vector<1xf32>
    %46 = vector.shape_cast %45 : vector<1xf32> to vector<1x1xf32>
    %47 = arith.addf %46, %4 : vector<1x1xf32>
    %cst_22 = arith.constant 0.000000e+00 : f32
    %48 = vector.broadcast %cst_22 : f32 to vector<1x1xf32>
    %49 = arith.subf %48, %47 : vector<1x1xf32>
    %50 = math.exp %49 : vector<1x1xf32>
    %cst_23 = arith.constant 1.000000e+00 : f32
    %51 = vector.broadcast %cst_23 : f32 to vector<1x1xf32>
    %52 = arith.addf %51, %50 : vector<1x1xf32>
    %cst_24 = arith.constant 1.000000e+00 : f32
    %53 = vector.broadcast %cst_24 : f32 to vector<1x1xf32>
    %54 = arith.divf %53, %52 : vector<1x1xf32>
    %55 = vector.shape_cast %54 : vector<1x1xf32> to vector<1x1xf32>
    %56 = vector.broadcast %55 : vector<1x1xf32> to vector<1x128xf32>
    %c0_25 = arith.constant 0 : index
    %c0_26 = arith.constant 0 : index
    %57 = vector.load %arg4[%c0_25, %c0_26] : memref<1x128xf32, #tpu.memory_space<vmem>>, vector<1x128xf32>
    tpu.vector_store %arg4[%c0_25, %c0_26], %56 {strides = array<i32>} : memref<1x128xf32, #tpu.memory_space<vmem>>, vector<1x128xf32>,
    return
  }
}

</mosaic_0001>

<bundles_post_ra>
// kernel: forward.1
= control target key start
LH: loop header
LB: loop body
LE: loop exit
PB: predicated region body
PF: predicated region fallthrough
CT: control target
= control target key end

     0   :  { %9 = vsyncpa [#allocation5], 0  ;;  %s779_s0 = inlined_call_operand.vmem [shape: bf16[16,16], index: 0, kind: input, shape index: {}]   ;;  %s780_s1 = inlined_call_operand.vmem [shape: bf16[144,64], index: 1, kind: input, shape index: {}]   ;;  %s781_s2 = inlined_call_operand.vmem [shape: bf16[128,128], index: 2, kind: input, shape index: {}]   ;;  %s782_s3 = inlined_call_operand.vmem [shape: f32[5,128], index: 3, kind: input, shape index: {}]   ;;  %s783_s4 = inlined_call_operand.hbm [shape: f32[1,128], index: 4, kind: output, shape index: {}]  }
   0x1   :  { %v637_v0 = vld [vmem:[%s781_s2] sm:$0xff]  ;;  %v642_v1 = vld [vmem:[%s781_s2 + $0x8] sm:$0xff]  ;;  %v647_v2 = vld [vmem:[%s781_s2 + $0x10] sm:$0xff] }
   0x2   :  { %v652_v3 = vld [vmem:[%s781_s2 + $0x18] sm:$0xff]  ;;  %v657_v4 = vld [vmem:[%s781_s2 + $0x20] sm:$0xff]  ;;  %v662_v5 = vld [vmem:[%s781_s2 + $0x28] sm:$0xff] }
   0x3   :  { %v667_v6 = vld [vmem:[%s781_s2 + $0x30] sm:$0xff]  ;;  %v672_v7 = vld [vmem:[%s781_s2 + $0x38] sm:$0xff] }
   0x4   :  { %72 = vsyncadd [#allocation3], 1024  ;;  %v677_v8 = vld [vmem:[%s782_s3 + $0x2] sm:$0x1]  ;;  %v682_v9 = vld [vmem:[%s782_s3 + $0x3] sm:$0x1]  ;;  %v144_v18 = vlaneseq }
   0x5   :  { %v687_v10 = vld [vmem:[%s782_s3 + $0x4] sm:$0x1]  ;;  %v605_v12 = vmov 0.0   ;;  %vm606_vm0 = vmmov 0   ;;  %vm97_vm1 = vcmask 130048   ;;  %v566_v14 = vld [vmem:[%s780_s1 + $0x28] sm:$0xff]  }
   0x6   :  { %v564_v11 = vld [vmem:[%s780_s1] sm:$0xff]   ;;  %501 = vmatprep.subr.bf16.mxu0 %v605_v12  ;;  %503 = vmatprep.mubr.msk.bf16.mxu0 %vm606_vm0, %v605_v12  ;;  %v567_v15 = vld [vmem:[%s780_s1 + $0x30] sm:$0xff]   ;;  %v568_v16 = vld [vmem:[%s780_s1 + $0x38] sm:$0xff]   ;;  %v145_v23 = vshrl.u32 %v144_v18, 7  ;;  %vm191_vm3 = vcmask 523264  }
   0x7   :  { %v565_v13 = vld [vmem:[%s779_s0] sm:$0xff]   ;;  %502 = vmatpush3.bf16.msra.mxu0 %v564_v11  ;;  %v570_v31 = vld [vmem:[%s780_s1 + $0x8] sm:$0xff]   ;;  %v571_v33 = vld [vmem:[%s780_s1 + $0x10] sm:$0xff]   ;;  %531 = vmatprep.subr.bf16.mxu1 %v605_v12 }
   0x8   :  { %507 = vmatprep.subr.bf16.mxu0 %v605_v12  ;;  %v569_v17 = vld [vmem:[%s780_s1 + $0x40] sm:$0xff]   ;;  %vm146_vm2 = vcmp.lt.s32.totalorder %v145_v23, 6  ;;  %v572_v34 = vld [vmem:[%s780_s1 + $0x18] sm:$0xff]   ;;  %539 = vmatprep.mubr.msk.bf16.mxu1 %vm606_vm0, %v605_v12 }
   0x9   :  { %v461_v19 = vld [vmem:[%s782_s3] ss:$0 sm:$0xff]  ;;  %v475_v40 = vld [vmem:[%s782_s3 + $0x1] ss:$0 sm:$0xff] }
   0xa   :  { %504 = vmatmul.mubr.msk.bf16.vlgmr.msra.gmra.mrb[0].mxu0 %vm97_vm1, %v565_v13  ;;  %v573_v35 = vld [vmem:[%s780_s1 + $0x20] sm:$0xff]  }
   0xb   :  { %508 = vmatpush3.bf16.msra.mxu0 %v566_v14  ;;  %515 = vmatprep.mubr.msk.bf16.mxu0 %vm606_vm0, %v605_v12 }
   0xc   :  { %509 = vmatprep.subr.bf16.mxu0 %v605_v12 }
   0xf   :  { %510 = vmatpush3.bf16.msra.mxu0 %v567_v15 }
  0x10   :  { %511 = vmatprep.subr.bf16.mxu0 %v605_v12 }
  0x13   :  { %512 = vmatpush3.bf16.msra.mxu0 %v568_v16 }
  0x14   :  { %513 = vmatprep.subr.bf16.mxu0 %v605_v12 }
  0x17   :  { %514 = vmatpush3.bf16.msra.mxu0 %v569_v17 }
  0x18   :  { %519 = vmatprep.subr.bf16.mxu0 %v605_v12 }
  0xdd   :  { %v135_v20 = vpop.f32.mrb[0].mxu0 }
  0xde   :  { %v505_v21 = vpop.f32.mrb[1].mxu0  ;;  %v136_v24 = vadd.f32 %v461_v19, %v135_v20 }
  0xdf   :  { %v138_v22 = vpop.f32.mrb[2].mxu0 }
  0xe0   :  { %v139_v25 = vadd.f32 %v461_v19, %v138_v22  ;;  %v506_v26 = vpop.f32.mrb[3].mxu0 }
  0xe2   :  { %v142_v27 = vmax.f32 %v136_v24, %v139_v25 }
  0xe4   :  { %v143_v28 = vmax.f32 %v142_v27, 0.0 }
  0xe6   :  { %v147_v29 = vsel %vm146_vm2, %v143_v28, 0.0 }
  0xe7   :  { %v148_v30 = vpack.c.bf16 %v147_v29, %v147_v29 }
  0xe9   :  { %v166_v32 = vrot.slane %v148_v30, 1 }
  0xeb   :  { %516 = vmatmul.mubr.msk.bf16.vlgmr.msra.gmra.mrb[4].mxu0 %vm191_vm3, %v166_v32 }
  0xec   :  { %520 = vmatpush3.bf16.msra.mxu0 %v570_v31  ;;  %527 = vmatprep.mubr.msk.bf16.mxu0 %vm606_vm0, %v605_v12 }
  0xed   :  { %521 = vmatprep.subr.bf16.mxu0 %v605_v12 }
  0xf0   :  { %522 = vmatpush3.bf16.msra.mxu0 %v571_v33 }
  0xf1   :  { %523 = vmatprep.subr.bf16.mxu0 %v605_v12 }
  0xf4   :  { %524 = vmatpush3.bf16.msra.mxu0 %v572_v34 }
  0xf5   :  { %525 = vmatprep.subr.bf16.mxu0 %v605_v12 }
  0xf8   :  { %526 = vmatpush3.bf16.msra.mxu0 %v573_v35 }
  0xfb   :  { %528 = vmatmul.mubr.msk.bf16.vlgmr.msra.gmra.mrb[8].mxu0 %vm191_vm3, %v148_v30 }
 0x1be   :  { %v229_v36 = vpop.f32.mrb[4].mxu0 }
 0x1bf   :  { %v517_v37 = vpop.f32.mrb[5].mxu0 }
 0x1c0   :  { %v232_v38 = vpop.f32.mrb[6].mxu0 }
 0x1c1   :  { %v518_v39 = vpop.f32.mrb[7].mxu0 }
 0x1ce   :  { %v296_v41 = vpop.f32.mrb[8].mxu0 }
 0x1cf   :  { %v297_v42 = vadd.f32 %v296_v41, %v229_v36  ;;  %v529_v43 = vpop.f32.mrb[9].mxu0 }
 0x1d0   :  { %v299_v44 = vpop.f32.mrb[10].mxu0 }
 0x1d1   :  { %v306_v45 = vadd.f32 %v475_v40, %v297_v42  ;;  %v530_v46 = vpop.f32.mrb[11].mxu0 }
 0x1d3   :  { %v308_v47 = vrot.slane %v306_v45, 2 }
 0x1d5   :  { %v310_v48 = vmax.f32 %v306_v45, %v308_v47 }
 0x1d7   :  { %v311_v49 = vmax.f32 %v310_v48, 0.0 }
 0x1d9   :  { %v312_v50 = vpack.c.bf16 %v311_v49, %v311_v49 }
 0x1da   :  { %601 = dma.done.wait [#allocation3], 1024 }
 0x1db   :  { %602 = vsyncadd [#allocation3], 4294966272  ;;  %532 = vmatpush3.bf16.msra.mxu1 %v637_v0  ;;  %v369_v51 = vshrl.u32 %v312_v50, 16  ;;  %vm416_vm4 = vcmask 1040384   ;;  %v607_v59 = vmov 0   ;;  %s608_s1 = smov [#allocation4]  }
 0x1dc   :  { %533 = vmatprep.subr.bf16.mxu1 %v605_v12  ;;  %574 = vset.pattern.permute.xlu0 %v607_v59  ;;  %s439_s3 = sshll.u32 %s608_s1, 4  ;;  %s440_s3 = int_to_ptr.vmem [resolvable:$true] %s439_s3 }
 0x1dd   :  { %s579_s7 = scalar_lea.vmem %s440_s3, 16  ;;  %s583_s8 = scalar_lea.vmem %s440_s3, 32 }
 0x1de   :  { %p580_p0 = scmp.ne.s32.totalorder %s440_s3, %s579_s7  ;;  %p584_p1 = scmp.lt.s32.totalorder %s440_s3, %s440_s3 }
 0x1df   :  { %534 = vmatpush3.bf16.msra.mxu1 %v642_v1  ;;  %p585_p2 = scmp.lt.s32.totalorder %s583_s8, %s579_s7 }
 0x1e0   :  { %535 = vmatprep.subr.bf16.mxu1 %v605_v12 }
 0x1e1   :  { %p586_p3 = por %p585_p2, %p584_p1 }
 0x1e3   :  { %536 = vmatpush3.bf16.msra.mxu1 %v647_v2  ;;  %p587_p4 = pnand %p586_p3, %p580_p0 }
 0x1e4   :  { %537 = vmatprep.subr.bf16.mxu1 %v605_v12 }
 0x1e7   :  { %538 = vmatpush3.bf16.msra.mxu1 %v652_v3 }
 0x1e8   :  { %543 = vmatprep.subr.bf16.mxu1 %v605_v12 }
 0x1ea   :  { %540 = vmatmul.mubr.msk.bf16.vlgmr.msra.gmra.mrb[0].mxu1 %vm191_vm3, %v312_v50 }
 0x1eb   :  { %544 = vmatpush3.bf16.msra.mxu1 %v657_v4  ;;  %551 = vmatprep.mubr.msk.bf16.mxu1 %vm606_vm0, %v605_v12 }
 0x1ec   :  { %545 = vmatprep.subr.bf16.mxu1 %v605_v12 }
 0x1ef   :  { %546 = vmatpush3.bf16.msra.mxu1 %v662_v5 }
 0x1f0   :  { %547 = vmatprep.subr.bf16.mxu1 %v605_v12 }
 0x1f3   :  { %548 = vmatpush3.bf16.msra.mxu1 %v667_v6 }
 0x1f4   :  { %549 = vmatprep.subr.bf16.mxu1 %v605_v12 }
 0x1f7   :  { %550 = vmatpush3.bf16.msra.mxu1 %v672_v7 }
 0x1fa   :  { %552 = vmatmul.mubr.msk.bf16.vlgmr.msra.gmra.mrb[0].mxu1 %vm191_vm3, %v369_v51 }
 0x2cd   :  { %v408_v52 = vpop.f32.mrb[0].mxu1 }
 0x2ce   :  { %v555_v53 = vadd.f32 %v408_v52, %v677_v8  ;;  %v553_v54 = vpop.f32.mrb[1].mxu1 }
 0x2cf   :  { %v411_v55 = vpop.f32.mrb[2].mxu1 }
 0x2d0   :  { %v415_v56 = vmul.f32 %v555_v53, %v682_v9  ;;  %v554_v57 = vpop.f32.mrb[3].mxu1 }
 0x2d2   :  { %v417_v58 = vsel %vm416_vm4, %v415_v56, 0.0 }
 0x2d3   :  { %418 = vadd.xlane.f32.xlu0 %v417_v58 }
 0x360   :  { %v419_v60 = vpop.xlane.xlu0 %418 }
 0x361   :  { %v420_v61 = vadd.f32 %v419_v60, %v687_v10 }
 0x363   :  { %v421_v62 = vsub.f32 0.0, %v420_v61 }
 0x365   :  { %v422_v63 = vmul.f32 1.442695, %v421_v62 }
 0x367   :  { %575 = vpow2.f32 %v422_v63 }
 0x371   :  { %v576_v0 = vpop.eup %575 }
 0x372   :  { %v424_v1 = vadd.f32 1.0, %v576_v0 }
 0x374   :  { %577 = vrcp.f32 %v424_v1 }
 0x37e   :  { %v578_v2 = vpop.eup %577 }
 0x37f   :  { %429 = vperm.xlu0 %574, %v578_v2  }
 0x3fe   :  { %v430_v3 = vpop.permute.xlu0 %429 }
 0x3ff   :  { %432 = vst [vmem:[#allocation4] sm:$0x1] %v430_v3 }
 0x400   :  { %590 = shalt.err (!%p587_p4)
}
 0x401   :  { %s591_s11 = scalar_lea.hbm %s783_s4, 16 }
 0x402   :  { %p592_p5 = scmp.ne.s32.totalorder %s783_s4, %s591_s11  ;;  %p595_p6 = scmp.lt.u32.totalorder %s591_s11, %s783_s4 }
 0x404   :  { %p597_p7 = pnand %p595_p6, %p592_p5 }
 0x406   :  { %600 = shalt.err (!%p597_p7)
}
 0x407   :  { %442 = dma.vmem_to_hbm [thread:$0]  %s440_s3, 16, %s783_s4, [#allocation5]  }
 0x408   :  { %603 = dma.done.wait [#allocation5], 16  }
 0x409   :  { %604 = vsyncadd [#allocation5], 4294967280 }
 0x40a   :  { %446 = vsyncpa [#allocation5], 1 }
 0x40b   :  { %447 = vsyncmov [#allocation3] }
 0x40e   :  { %s448_s16 = vpop.sfrf %447 }
 0x40f   :  { %p478_p8 = scmp.ne.s32.totalorder %s448_s16, 0 }
 0x411   :  { %452 = shalt.err (%p478_p8)  }

</bundles_post_ra>
